<compile_context>
chip_gen: v5e
topology: v5e:2x2
jax: 0.10.0
libtpu: 0.0.40
codegen_flags: <defaults>
</compile_context>

<pallas_src>
import math
import functools

import jax
import jax.numpy as jnp
from jax.experimental import pallas as pl
from jax.experimental.pallas import tpu as pltpu


def _round_up(x, m):
    return (x + m - 1) // m * m


def _gelu_new(x):
    # GPT-2 "gelu_new": 0.5*x*(1+tanh(sqrt(2/pi)*(x + 0.044715*x^3)))
    c = math.sqrt(2.0 / math.pi)
    return 0.5 * x * (1.0 + jnp.tanh(c * (x + 0.044715 * x * x * x)))


def _mlp_kernel(x_ref, w1_ref, b1_ref, w2_ref, b2_ref, out_ref):
    # c_fc: (tm, Hp) @ (Hp, Ip), bf16 operands, fp32 accumulation; bias in fp32.
    h = jnp.dot(x_ref[...], w1_ref[...],
                preferred_element_type=jnp.float32) + b1_ref[...]
    # gelu_new in fp32 (tanh goes to the EUP slot).
    h = _gelu_new(h)
    # c_proj: cast back to the matmul dtype for the MXU, accumulate in fp32.
    y = jnp.dot(h.astype(w2_ref.dtype), w2_ref[...],
                preferred_element_type=jnp.float32) + b2_ref[...]
    # TODO(synk): nn.Dropout(resid_pdrop) is identity in eval mode; training-mode
    # RNG dropout is not implemented here.
    out_ref[...] = y.astype(out_ref.dtype)


@functools.partial(jax.jit, static_argnames=("tm", "matmul_dtype"))
def decision_transformer_gpt2_mlp(hidden_states, w_fc, b_fc, w_proj, b_proj,
                                  tm=256, matmul_dtype=jnp.bfloat16):
    """hidden_states: (B, S, H); w_fc: (H, I); b_fc: (I,); w_proj: (I, H); b_proj: (H,)."""
    B, S, H = hidden_states.shape
    I = w_fc.shape[1]
    M = B * S
    out_dtype = hidden_states.dtype

    # Padded, lane-dense problem sizes.
    Hp = _round_up(H, 128)
    Ip = _round_up(I, 128)
    tm = min(tm, _round_up(M, 128))     # multiple of 128 -> MXU-aligned, >= bf16 min sublanes
    Mp = _round_up(M, tm)

    # Wrapper-side padding + bf16 cast (padded rows/cols contribute zero).
    x2d = jnp.pad(hidden_states.reshape(M, H).astype(matmul_dtype),
                  ((0, Mp - M), (0, Hp - H)))
    w1 = jnp.pad(w_fc.astype(matmul_dtype), ((0, Hp - H), (0, Ip - I)))
    w2 = jnp.pad(w_proj.astype(matmul_dtype), ((0, Ip - I), (0, Hp - H)))
    b1 = jnp.pad(b_fc.astype(jnp.float32), (0, Ip - I)).reshape(1, Ip)
    b2 = jnp.pad(b_proj.astype(jnp.float32), (0, Hp - H)).reshape(1, Hp)

    in_itemsize = jnp.dtype(matmul_dtype).itemsize
    out_itemsize = jnp.dtype(out_dtype).itemsize
    cost = pl.CostEstimate(
        flops=4 * Mp * Hp * Ip,                        # two matmuls
        transcendentals=Mp * Ip,                       # tanh in gelu_new
        bytes_accessed=(Mp * Hp * in_itemsize          # x
                        + Hp * Ip * in_itemsize        # c_fc weight
                        + Ip * Hp * in_itemsize        # c_proj weight
                        + (Ip + Hp) * 4                # biases (fp32)
                        + Mp * Hp * out_itemsize),     # output
    )

    out = pl.pallas_call(
        _mlp_kernel,
        out_shape=jax.ShapeDtypeStruct((Mp, Hp), out_dtype),
        grid_spec=pltpu.PrefetchScalarGridSpec(
            num_scalar_prefetch=0,
            grid=(Mp // tm,),
            in_specs=[
                pl.BlockSpec((tm, Hp), lambda i: (i, 0)),   # x row-tile
                pl.BlockSpec((Hp, Ip), lambda i: (0, 0)),   # c_fc weight (VMEM resident)
                pl.BlockSpec((1, Ip), lambda i: (0, 0)),    # c_fc bias (fp32)
                pl.BlockSpec((Ip, Hp), lambda i: (0, 0)),   # c_proj weight (VMEM resident)
                pl.BlockSpec((1, Hp), lambda i: (0, 0)),    # c_proj bias (fp32)
            ],
            out_specs=pl.BlockSpec((tm, Hp), lambda i: (i, 0)),
        ),
        compiler_params=pltpu.CompilerParams(
            dimension_semantics=("parallel",),
            vmem_limit_bytes=64 * 1024 * 1024,
        ),
        cost_estimate=cost,
    )(x2d, w1, b1, w2, b2)

    return out[:M, :H].reshape(B, S, H)


def _reference(hidden_states, w_fc, b_fc, w_proj, b_proj, matmul_dtype=jnp.bfloat16):
    # Same bf16-operand / fp32-accumulate recipe as the kernel.
    x = hidden_states.astype(matmul_dtype)
    h = jnp.einsum("bsh,hi->bsi", x, w_fc.astype(matmul_dtype),
                   preferred_element_type=jnp.float32) + b_fc
    h = _gelu_new(h)
    y = jnp.einsum("bsi,ih->bsh", h.astype(matmul_dtype), w_proj.astype(matmul_dtype),
                   preferred_element_type=jnp.float32) + b_proj
    return y.astype(hidden_states.dtype)


def _run_case(key, B, S, H):
    I = 4 * H
    kx, kw1, kb1, kw2, kb2 = jax.random.split(key, 5)
    x = jax.random.normal(kx, (B, S, H), dtype=jnp.float32)
    # Conv1D init: weight ~ N(0, 0.02), bias tiny-random here for coverage.
    w_fc = 0.02 * jax.random.normal(kw1, (H, I), dtype=jnp.float32)
    b_fc = 0.01 * jax.random.normal(kb1, (I,), dtype=jnp.float32)
    w_proj = 0.02 * jax.random.normal(kw2, (I, H), dtype=jnp.float32)
    b_proj = 0.01 * jax.random.normal(kb2, (H,), dtype=jnp.float32)

    out = decision_transformer_gpt2_mlp(x, w_fc, b_fc, w_proj, b_proj)
    out = jax.block_until_ready(out)

    ref = _reference(x, w_fc, b_fc, w_proj, b_proj)
    assert out.shape == (B, S, H)
    assert jnp.allclose(out, ref, atol=2e-3, rtol=2e-2), "mismatch vs reference"
    return out


if __name__ == "__main__":
    key = jax.random.PRNGKey(0)
    k1, k2 = jax.random.split(key)
    # Toy DecisionTransformer config: hidden=32, intermediate=4*hidden.
    # Exercises the padding path: H 32->128 lanes, I 128, M 16 -> one 128-row tile.
    _run_case(k1, B=2, S=8, H=32)
    # Lane-aligned config (H=128): no-padding path.
    _run_case(k2, B=2, S=8, H=128)
    print("KERNEL_OK")
</pallas_src>

<mosaic_0001>
module attributes {stable_mosaic.version = 11 : i64} {
  func.func @_mlp_kernel(%arg0: i32, %arg1: memref<128x128xbf16, #tpu.memory_space<vmem>>, %arg2: memref<128x128xbf16, #tpu.memory_space<vmem>>, %arg3: memref<1x128xf32, #tpu.memory_space<vmem>>, %arg4: memref<128x128xbf16, #tpu.memory_space<vmem>>, %arg5: memref<1x128xf32, #tpu.memory_space<vmem>>, %arg6: memref<128x128xf32, #tpu.memory_space<vmem>>) attributes {dimension_semantics = [#tpu.dimension_semantics<parallel>], iteration_bounds = array<i64: 1>, scalar_prefetch = 0 : i64, scratch_operands = 0 : i64, tpu.core_type = #tpu.core_type<tc>, window_params = [{transform_indices = @transform_0, window_bounds = array<i64: 128, 128>}, {pipeline_mode = #tpu.pipeline_mode<synchronous>, transform_indices = @transform_1, window_bounds = array<i64: 128, 128>}, {pipeline_mode = #tpu.pipeline_mode<synchronous>, transform_indices = @transform_2, window_bounds = array<i64: 1, 128>}, {pipeline_mode = #tpu.pipeline_mode<synchronous>, transform_indices = @transform_3, window_bounds = array<i64: 128, 128>}, {pipeline_mode = #tpu.pipeline_mode<synchronous>, transform_indices = @transform_4, window_bounds = array<i64: 1, 128>}, {transform_indices = @transform_5, window_bounds = array<i64: 128, 128>}]} {
    %c0 = arith.constant 0 : index
    %c0_0 = arith.constant 0 : index
    %0 = vector.load %arg1[%c0, %c0_0] : memref<128x128xbf16, #tpu.memory_space<vmem>>, vector<128x128xbf16>
    %c0_1 = arith.constant 0 : index
    %c0_2 = arith.constant 0 : index
    %1 = vector.load %arg2[%c0_1, %c0_2] : memref<128x128xbf16, #tpu.memory_space<vmem>>, vector<128x128xbf16>
    %cst = arith.constant dense<0.000000e+00> : vector<128x128xf32>
    %2 = tpu.matmul %0, %1, %cst {dimension_numbers = #tpu.dot_dimension_numbers<[1], [0], [0], [1], [0, 0, 1, 1], [], []>} : vector<128x128xbf16>, vector<128x128xbf16>, vector<128x128xf32> -> vector<128x128xf32>
    %c0_3 = arith.constant 0 : index
    %c0_4 = arith.constant 0 : index
    %3 = vector.load %arg3[%c0_3, %c0_4] : memref<1x128xf32, #tpu.memory_space<vmem>>, vector<1x128xf32>
    %4 = vector.broadcast %3 : vector<1x128xf32> to vector<128x128xf32>
    %5 = arith.addf %2, %4 : vector<128x128xf32>
    %cst_5 = arith.constant 5.000000e-01 : f32
    %6 = vector.broadcast %cst_5 : f32 to vector<128x128xf32>
    %7 = arith.mulf %6, %5 : vector<128x128xf32>
    %cst_6 = arith.constant 4.471500e-02 : f32
    %8 = vector.broadcast %cst_6 : f32 to vector<128x128xf32>
    %9 = arith.mulf %8, %5 : vector<128x128xf32>
    %10 = arith.mulf %9, %5 : vector<128x128xf32>
    %11 = arith.mulf %10, %5 : vector<128x128xf32>
    %12 = arith.addf %5, %11 : vector<128x128xf32>
    %cst_7 = arith.constant 0.797884583 : f32
    %13 = vector.broadcast %cst_7 : f32 to vector<128x128xf32>
    %14 = arith.mulf %13, %12 : vector<128x128xf32>
    %15 = math.tanh %14 : vector<128x128xf32>
    %cst_8 = arith.constant 1.000000e+00 : f32
    %16 = vector.broadcast %cst_8 : f32 to vector<128x128xf32>
    %17 = arith.addf %16, %15 : vector<128x128xf32>
    %18 = arith.mulf %7, %17 : vector<128x128xf32>
    %19 = arith.truncf %18 : vector<128x128xf32> to vector<128x128xbf16>
    %c0_9 = arith.constant 0 : index
    %c0_10 = arith.constant 0 : index
    %20 = vector.load %arg4[%c0_9, %c0_10] : memref<128x128xbf16, #tpu.memory_space<vmem>>, vector<128x128xbf16>
    %cst_11 = arith.constant dense<0.000000e+00> : vector<128x128xf32>
    %21 = tpu.matmul %19, %20, %cst_11 {dimension_numbers = #tpu.dot_dimension_numbers<[1], [0], [0], [1], [0, 0, 1, 1], [], []>} : vector<128x128xbf16>, vector<128x128xbf16>, vector<128x128xf32> -> vector<128x128xf32>
    %c0_12 = arith.constant 0 : index
    %c0_13 = arith.constant 0 : index
    %22 = vector.load %arg5[%c0_12, %c0_13] : memref<1x128xf32, #tpu.memory_space<vmem>>, vector<1x128xf32>
    %23 = vector.broadcast %22 : vector<1x128xf32> to vector<128x128xf32>
    %24 = arith.addf %21, %23 : vector<128x128xf32>
    %c0_14 = arith.constant 0 : index
    %c0_15 = arith.constant 0 : index
    %25 = vector.load %arg6[%c0_14, %c0_15] : memref<128x128xf32, #tpu.memory_space<vmem>>, vector<128x128xf32>
    tpu.vector_store %arg6[%c0_14, %c0_15], %24 {strides = array<i32>} : memref<128x128xf32, #tpu.memory_space<vmem>>, vector<128x128xf32>,
    return
  }
  func.func @transform_0(%arg0: i32) -> (i32, i32) {
    %c0_i32 = arith.constant 0 : i32
    %c0_i32_0 = arith.constant 0 : i32
    return %arg0, %c0_i32 : i32, i32
  }
  func.func @transform_1(%arg0: i32) -> (i32, i32) {
    %c0_i32 = arith.constant 0 : i32
    %c0_i32_0 = arith.constant 0 : i32
    %c0_i32_1 = arith.constant 0 : i32
    return %c0_i32, %c0_i32_0 : i32, i32
  }
  func.func @transform_2(%arg0: i32) -> (i32, i32) {
    %c0_i32 = arith.constant 0 : i32
    %c0_i32_0 = arith.constant 0 : i32
    %c0_i32_1 = arith.constant 0 : i32
    return %c0_i32, %c0_i32_0 : i32, i32
  }
  func.func @transform_3(%arg0: i32) -> (i32, i32) {
    %c0_i32 = arith.constant 0 : i32
    %c0_i32_0 = arith.constant 0 : i32
    %c0_i32_1 = arith.constant 0 : i32
    return %c0_i32, %c0_i32_0 : i32, i32
  }
  func.func @transform_4(%arg0: i32) -> (i32, i32) {
    %c0_i32 = arith.constant 0 : i32
    %c0_i32_0 = arith.constant 0 : i32
    %c0_i32_1 = arith.constant 0 : i32
    return %c0_i32, %c0_i32_0 : i32, i32
  }
  func.func @transform_5(%arg0: i32) -> (i32, i32) {
    %c0_i32 = arith.constant 0 : i32
    %c0_i32_0 = arith.constant 0 : i32
    return %arg0, %c0_i32 : i32, i32
  }
}

</mosaic_0001>

<bundles_post_ra>
// kernel: decision_transformer_gpt2_mlp.1
= control target key start
LH: loop header
LB: loop body
LE: loop exit
PB: predicated region body
PF: predicated region fallthrough
CT: control target
= control target key end

     0   :  { %s890_s1 = inlined_call_operand.vmem [shape: bf16[128,128], index: 1, kind: input, shape index: {}]   ;;  %s891_s2 = inlined_call_operand.vmem [shape: f32[1,128], index: 2, kind: input, shape index: {}]   ;;  %s892_s0 = inlined_call_operand.vmem [shape: bf16[128,128], index: 0, kind: input, shape index: {}]   ;;  %s893_s4 = inlined_call_operand.vmem [shape: f32[1,128], index: 4, kind: input, shape index: {}]   ;;  %s894_s3 = inlined_call_operand.vmem [shape: bf16[128,128], index: 3, kind: input, shape index: {}]   ;;  %s895_s5 = inlined_call_operand.vmem [shape: f32[128,128], index: 5, kind: output, shape index: {}]  }
   0x1   :  { %v601_v0 = vld [vmem:[%s890_s1 + $0x38] sm:$0xff]  ;;  %v600_v1 = vld [vmem:[%s890_s1 + $0x30] sm:$0xff]  ;;  %v599_v2 = vld [vmem:[%s890_s1 + $0x28] sm:$0xff] }
   0x2   :  { %152 = vmatpush.bf16.msra.mxu0 %v601_v0  ;;  %610 = vmatpush.bf16.msra.mxu2 %v601_v0  ;;  %v598_v3 = vld [vmem:[%s890_s1 + $0x20] sm:$0xff]  ;;  %v597_v4 = vld [vmem:[%s890_s1 + $0x18] sm:$0xff]  ;;  %v596_v5 = vld [vmem:[%s890_s1 + $0x10] sm:$0xff] }
   0x3   :  { %v595_v6 = vld [vmem:[%s890_s1 + $0x8] sm:$0xff]  ;;  %v594_v7 = vld [vmem:[%s890_s1] sm:$0xff]  ;;  %v588_v12 = vld [vmem:[%s892_s0 + $0x10] sm:$0xff] }
   0x4   :  { %v586_v8 = vld [vmem:[%s892_s0] sm:$0xff]  ;;  %v587_v10 = vld [vmem:[%s892_s0 + $0x8] sm:$0xff]  ;;  %v592_v13 = vld [vmem:[%s892_s0 + $0x30] sm:$0xff] }
   0x5   :  { %v590_v9 = vld [vmem:[%s892_s0 + $0x20] sm:$0xff]  ;;  %v591_v11 = vld [vmem:[%s892_s0 + $0x28] sm:$0xff]  ;;  %v589_v14 = vld [vmem:[%s892_s0 + $0x18] sm:$0xff] }
   0x6   :  { %153 = vmatpush.bf16.msra.mxu0 %v600_v1  ;;  %611 = vmatpush.bf16.msra.mxu2 %v600_v1  ;;  %v593_v15 = vld [vmem:[%s892_s0 + $0x38] sm:$0xff]  ;;  %v608_v17 = vld [vmem:[%s894_s3 + $0x30] sm:$0xff]  ;;  %v607_v18 = vld [vmem:[%s894_s3 + $0x28] sm:$0xff] }
   0x7   :  { %v609_v16 = vld [vmem:[%s894_s3 + $0x38] sm:$0xff]  ;;  %v606_v19 = vld [vmem:[%s894_s3 + $0x20] sm:$0xff]  ;;  %v604_v21 = vld [vmem:[%s894_s3 + $0x10] sm:$0xff] }
   0x8   :  { %421 = vmatpush.bf16.msra.mxu1 %v609_v16  ;;  %618 = vmatpush.bf16.msra.mxu3 %v609_v16  ;;  %v605_v20 = vld [vmem:[%s894_s3 + $0x18] sm:$0xff]  ;;  %v603_v22 = vld [vmem:[%s894_s3 + $0x8] sm:$0xff]  ;;  %v762_v23 = vld [vmem:[%s891_s2] ss:$0 sm:$0xff] }
   0x9   :  { %v602_v24 = vld [vmem:[%s894_s3] sm:$0xff] }
   0xa   :  { %154 = vmatpush.bf16.msra.mxu0 %v599_v2  ;;  %612 = vmatpush.bf16.msra.mxu2 %v599_v2 }
   0xc   :  { %422 = vmatpush.bf16.msra.mxu1 %v608_v17  ;;  %619 = vmatpush.bf16.msra.mxu3 %v608_v17 }
   0xe   :  { %155 = vmatpush.bf16.msra.mxu0 %v598_v3  ;;  %613 = vmatpush.bf16.msra.mxu2 %v598_v3 }
  0x10   :  { %423 = vmatpush.bf16.msra.mxu1 %v607_v18  ;;  %620 = vmatpush.bf16.msra.mxu3 %v607_v18 }
  0x12   :  { %156 = vmatpush.bf16.msra.mxu0 %v597_v4  ;;  %614 = vmatpush.bf16.msra.mxu2 %v597_v4 }
  0x14   :  { %424 = vmatpush.bf16.msra.mxu1 %v606_v19  ;;  %621 = vmatpush.bf16.msra.mxu3 %v606_v19 }
  0x16   :  { %157 = vmatpush.bf16.msra.mxu0 %v596_v5  ;;  %615 = vmatpush.bf16.msra.mxu2 %v596_v5 }
  0x18   :  { %425 = vmatpush.bf16.msra.mxu1 %v605_v20  ;;  %622 = vmatpush.bf16.msra.mxu3 %v605_v20 }
  0x1a   :  { %158 = vmatpush.bf16.msra.mxu0 %v595_v6  ;;  %616 = vmatpush.bf16.msra.mxu2 %v595_v6 }
  0x1c   :  { %426 = vmatpush.bf16.msra.mxu1 %v604_v21  ;;  %623 = vmatpush.bf16.msra.mxu3 %v604_v21 }
  0x1e   :  { %159 = vmatpush.bf16.msra.mxu0 %v594_v7  ;;  %617 = vmatpush.bf16.msra.mxu2 %v594_v7 }
  0x20   :  { %427 = vmatpush.bf16.msra.mxu1 %v603_v22  ;;  %624 = vmatpush.bf16.msra.mxu3 %v603_v22 }
  0x21   :  { %160 = vmatmul.bf16.vlgmr.msra.gmra.mxu0 %v586_v8  ;;  %180 = vmatmul.bf16.vlgmr.msra.gmra.mxu2 %v590_v9 }
  0x24   :  { %428 = vmatpush.bf16.msra.mxu1 %v602_v24  ;;  %625 = vmatpush.bf16.msra.mxu3 %v602_v24 }
  0x31   :  { %165 = vmatmul.bf16.gmra.mxu0 %v587_v10  ;;  %185 = vmatmul.bf16.gmra.mxu2 %v591_v11 }
  0x41   :  { %170 = vmatmul.bf16.gmra.mxu0 %v588_v12  ;;  %190 = vmatmul.bf16.gmra.mxu2 %v592_v13 }
  0x51   :  { %175 = vmatmul.bf16.gmra.mxu0 %v589_v14  ;;  %195 = vmatmul.bf16.gmra.mxu2 %v593_v15 }
  0x9e   :  { %v161_v25 = vpop.f32.mrf.mxu0 }
  0x9f   :  { %v162_v26 = vadd.f32 %v762_v23, %v161_v25 }
  0xa1   :  { %v217_v27 = vmul.f32 0.044715, %v162_v26  ;;  %v201_v4 = vmul.f32 0.5, %v162_v26 }
  0xa3   :  { %v233_v28 = vmul.f32 %v217_v27, %v162_v26 }
  0xa4   :  { %v181_v29 = vpop.f32.mrf.mxu2 }
  0xa5   :  { %v769_v30 = vadd.f32 %v762_v23, %v181_v29  ;;  %v249_v31 = vmul.f32 %v233_v28, %v162_v26 }
  0xa6   :  { %v163_v32 = vpop.f32.mrf.mxu0 }
  0xa7   :  { %v225_v33 = vmul.f32 0.044715, %v769_v30  ;;  %v164_v34 = vadd.f32 %v762_v23, %v163_v32  ;;  %v265_v35 = vadd.f32 %v249_v31, %v162_v26  ;;  %v209_v26 = vmul.f32 0.5, %v769_v30 }
  0xa9   :  { %v218_v36 = vmul.f32 0.044715, %v164_v34  ;;  %v241_v37 = vmul.f32 %v225_v33, %v769_v30  ;;  %v281_v39 = vmul.f32 0.7978846, %v265_v35  ;;  %v202_v5 = vmul.f32 0.5, %v164_v34 }
  0xab   :  { %v234_v38 = vmul.f32 %v218_v36, %v164_v34  ;;  %v257_v40 = vmul.f32 %v241_v37, %v769_v30  ;;  %628 = vtanh.f32 %v281_v39 }
  0xac   :  { %v183_v41 = vpop.f32.mrf.mxu2 }
  0xad   :  { %v184_v42 = vadd.f32 %v762_v23, %v183_v41  ;;  %v250_v43 = vmul.f32 %v234_v38, %v164_v34  ;;  %v273_v44 = vadd.f32 %v257_v40, %v769_v30 }
  0xae   :  { %v166_v45 = vpop.f32.mrf.mxu0 }
  0xaf   :  { %v226_v46 = vmul.f32 0.044715, %v184_v42  ;;  %v778_v47 = vadd.f32 %v762_v23, %v166_v45  ;;  %v266_v48 = vadd.f32 %v250_v43, %v164_v34  ;;  %v289_v52 = vmul.f32 0.7978846, %v273_v44 }
  0xb0   :  { %v210_v27 = vmul.f32 0.5, %v184_v42 }
  0xb1   :  { %v219_v49 = vmul.f32 0.044715, %v778_v47  ;;  %v282_v50 = vmul.f32 0.7978846, %v266_v48  ;;  %v242_v51 = vmul.f32 %v226_v46, %v184_v42  ;;  %v629_v56 = vpop.eup %628 }
  0xb2   :  { %v313_v1 = vadd.f32 1.0, %v629_v56 }
  0xb3   :  { %630 = vtanh.f32 %v282_v50  ;;  %v258_v53 = vmul.f32 %v242_v51, %v184_v42  ;;  %v235_v54 = vmul.f32 %v219_v49, %v778_v47 }
  0xb4   :  { %v186_v55 = vpop.f32.mrf.mxu2  ;;  %632 = vtanh.f32 %v289_v52  ;;  %v329_v12 = vmul.f32 %v313_v1, %v201_v4  ;;  %v203_v52 = vmul.f32 0.5, %v778_v47 }
  0xb5   :  { %v783_v57 = vadd.f32 %v762_v23, %v186_v55  ;;  %v274_v58 = vadd.f32 %v258_v53, %v184_v42  ;;  %v251_v59 = vmul.f32 %v235_v54, %v778_v47 }
  0xb6   :  { %v168_v60 = vpop.f32.mrf.mxu0 }
  0xb7   :  { %v227_v61 = vmul.f32 0.044715, %v783_v57  ;;  %v169_v62 = vadd.f32 %v762_v23, %v168_v60  ;;  %v290_v63 = vmul.f32 0.7978846, %v274_v58  ;;  %v267_v0 = vadd.f32 %v251_v59, %v778_v47 }
  0xb9   :  { %v631_v2 = vpop.eup %630  ;;  %v220_v3 = vmul.f32 0.044715, %v169_v62  ;;  %634 = vtanh.f32 %v290_v63  ;;  %v243_v7 = vmul.f32 %v227_v61, %v783_v57  ;;  %v283_v10 = vmul.f32 0.7978846, %v267_v0 }
  0xba   :  { %v314_v6 = vadd.f32 1.0, %v631_v2  ;;  %v633_v8 = vpop.eup %632  ;;  %v204_v53 = vmul.f32 0.5, %v169_v62 }
  0xbb   :  { %v236_v9 = vmul.f32 %v220_v3, %v169_v62  ;;  %v259_v14 = vmul.f32 %v243_v7, %v783_v57  ;;  %v321_v19 = vadd.f32 1.0, %v633_v8  ;;  %636 = vtanh.f32 %v283_v10 }
  0xbc   :  { %v188_v11 = vpop.f32.mrf.mxu2  ;;  %v330_v13 = vmul.f32 %v314_v6, %v202_v5 }
  0xbd   :  { %v792_v15 = vadd.f32 %v762_v23, %v188_v11  ;;  %v252_v16 = vmul.f32 %v236_v9, %v169_v62  ;;  %v275_v20 = vadd.f32 %v259_v14, %v783_v57  ;;  %v337_v34 = vmul.f32 %v321_v19, %v209_v26 }
  0xbe   :  { %v171_v17 = vpop.f32.mrf.mxu0  ;;  %v345_v18 = vpack.c.bf16 %v330_v13, %v329_v12  ;;  %v211_v9 = vmul.f32 0.5, %v783_v57 }
  0xbf   :  { %v635_v21 = vpop.eup %634  ;;  %v228_v22 = vmul.f32 0.044715, %v792_v15  ;;  %v797_v24 = vadd.f32 %v762_v23, %v171_v17  ;;  %v268_v25 = vadd.f32 %v252_v16, %v169_v62  ;;  %v291_v33 = vmul.f32 0.7978846, %v275_v20 }
  0xc0   :  { %429 = vmatmul.bf16.vlgmr.msra.gmra.mxu1 %v345_v18  ;;  %v322_v28 = vadd.f32 1.0, %v635_v21  ;;  %v212_v10 = vmul.f32 0.5, %v792_v15 }
  0xc1   :  { %v221_v29 = vmul.f32 0.044715, %v797_v24  ;;  %v284_v31 = vmul.f32 0.7978846, %v268_v25  ;;  %v244_v32 = vmul.f32 %v228_v22, %v792_v15  ;;  %v637_v40 = vpop.eup %636 }
  0xc2   :  { %v338_v35 = vmul.f32 %v322_v28, %v210_v27  ;;  %v315_v49 = vadd.f32 1.0, %v637_v40 }
  0xc3   :  { %638 = vtanh.f32 %v284_v31  ;;  %v260_v36 = vmul.f32 %v244_v32, %v792_v15  ;;  %v237_v37 = vmul.f32 %v221_v29, %v797_v24 }
  0xc4   :  { %v191_v38 = vpop.f32.mrf.mxu2  ;;  %v349_v39 = vpack.c.bf16 %v338_v35, %v337_v34  ;;  %640 = vtanh.f32 %v291_v33  ;;  %v331_v61 = vmul.f32 %v315_v49, %v203_v52 }
  0xc5   :  { %v805_v30 = vadd.f32 %v762_v23, %v191_v38  ;;  %v276_v41 = vadd.f32 %v260_v36, %v792_v15  ;;  %v253_v42 = vmul.f32 %v237_v37, %v797_v24  ;;  %v205_v36 = vmul.f32 0.5, %v797_v24 }
  0xc6   :  { %v173_v43 = vpop.f32.mrf.mxu0  ;;  %449 = vmatmul.bf16.vlgmr.msra.gmra.mxu3 %v349_v39 }
  0xc7   :  { %v229_v44 = vmul.f32 0.044715, %v805_v30  ;;  %v174_v45 = vadd.f32 %v762_v23, %v173_v43  ;;  %v292_v46 = vmul.f32 0.7978846, %v276_v41  ;;  %v269_v48 = vadd.f32 %v253_v42, %v797_v24 }
  0xc9   :  { %v639_v50 = vpop.eup %638  ;;  %v222_v51 = vmul.f32 0.044715, %v174_v45  ;;  %642 = vtanh.f32 %v292_v46  ;;  %v245_v55 = vmul.f32 %v229_v44, %v805_v30  ;;  %v285_v59 = vmul.f32 0.7978846, %v269_v48 }
  0xca   :  { %v316_v54 = vadd.f32 1.0, %v639_v50  ;;  %v641_v56 = vpop.eup %640  ;;  %v206_v37 = vmul.f32 0.5, %v174_v45 }
  0xcb   :  { %v238_v58 = vmul.f32 %v222_v51, %v174_v45  ;;  %v261_v0 = vmul.f32 %v245_v55, %v805_v30  ;;  %v323_v5 = vadd.f32 1.0, %v641_v56  ;;  %644 = vtanh.f32 %v285_v59 }
  0xcc   :  { %v193_v60 = vpop.f32.mrf.mxu2  ;;  %v332_v63 = vmul.f32 %v316_v54, %v204_v53  ;;  %v213_v55 = vmul.f32 0.5, %v805_v30 }
  0xcd   :  { %v194_v1 = vadd.f32 %v762_v23, %v193_v60  ;;  %v254_v2 = vmul.f32 %v238_v58, %v174_v45  ;;  %v277_v47 = vadd.f32 %v261_v0, %v805_v30  ;;  %v339_v17 = vmul.f32 %v323_v5, %v211_v9 }
  0xce   :  { %v176_v3 = vpop.f32.mrf.mxu0  ;;  %v346_v4 = vpack.c.bf16 %v332_v63, %v331_v61 }
  0xcf   :  { %v643_v62 = vpop.eup %642  ;;  %v230_v6 = vmul.f32 0.044715, %v194_v1  ;;  %v818_v7 = vadd.f32 %v762_v23, %v176_v3  ;;  %v270_v8 = vadd.f32 %v254_v2, %v174_v45  ;;  %v293_v16 = vmul.f32 0.7978846, %v277_v47 }
  0xd0   :  { %434 = vmatmul.bf16.gmra.mxu1 %v346_v4  ;;  %v324_v11 = vadd.f32 1.0, %v643_v62  ;;  %v214_v56 = vmul.f32 0.5, %v194_v1 }
  0xd1   :  { %v223_v12 = vmul.f32 0.044715, %v818_v7  ;;  %v286_v13 = vmul.f32 0.7978846, %v270_v8  ;;  %v246_v14 = vmul.f32 %v230_v6, %v194_v1  ;;  %v645_v25 = vpop.eup %644  ;;  %v207_v30 = vmul.f32 0.5, %v818_v7 }
  0xd2   :  { %v340_v18 = vmul.f32 %v324_v11, %v212_v10  ;;  %v317_v33 = vadd.f32 1.0, %v645_v25 }
  0xd3   :  { %646 = vtanh.f32 %v286_v13  ;;  %v262_v19 = vmul.f32 %v246_v14, %v194_v1  ;;  %v239_v20 = vmul.f32 %v223_v12, %v818_v7 }
  0xd4   :  { %v196_v21 = vpop.f32.mrf.mxu2  ;;  %v350_v22 = vpack.c.bf16 %v340_v18, %v339_v17  ;;  %648 = vtanh.f32 %v293_v16  ;;  %v333_v44 = vmul.f32 %v317_v33, %v205_v36 }
  0xd5   :  { %v825_v26 = vadd.f32 %v762_v23, %v196_v21  ;;  %v278_v57 = vadd.f32 %v262_v19, %v194_v1  ;;  %v255_v15 = vmul.f32 %v239_v20, %v818_v7 }
  0xd6   :  { %v178_v27 = vpop.f32.mrf.mxu0  ;;  %454 = vmatmul.bf16.gmra.mxu3 %v350_v22 }
  0xd7   :  { %v231_v28 = vmul.f32 0.044715, %v825_v26  ;;  %v179_v29 = vadd.f32 %v762_v23, %v178_v27  ;;  %v294_v31 = vmul.f32 0.7978846, %v278_v57  ;;  %v271_v32 = vadd.f32 %v255_v15, %v818_v7  ;;  %v627_v7 = vld [vmem:[%s893_s4] ss:$0 sm:$0xff] }
  0xd8   :  { %v215_v14 = vmul.f32 0.5, %v825_v26 }
  0xd9   :  { %v647_v34 = vpop.eup %646  ;;  %v224_v35 = vmul.f32 0.044715, %v179_v29  ;;  %650 = vtanh.f32 %v294_v31  ;;  %v247_v39 = vmul.f32 %v231_v28, %v825_v26  ;;  %v287_v42 = vmul.f32 0.7978846, %v271_v32 }
  0xda   :  { %v318_v38 = vadd.f32 1.0, %v647_v34  ;;  %v649_v40 = vpop.eup %648  ;;  %v208_v1 = vmul.f32 0.5, %v179_v29 }
  0xdb   :  { %v240_v41 = vmul.f32 %v224_v35, %v179_v29  ;;  %v263_v48 = vmul.f32 %v247_v39, %v825_v26  ;;  %v325_v52 = vadd.f32 1.0, %v649_v40  ;;  %652 = vtanh.f32 %v287_v42 }
  0xdc   :  { %v198_v43 = vpop.f32.mrf.mxu2  ;;  %v334_v46 = vmul.f32 %v318_v38, %v206_v37 }
  0xdd   :  { %v199_v49 = vadd.f32 %v762_v23, %v198_v43  ;;  %v256_v50 = vmul.f32 %v240_v41, %v179_v29  ;;  %v279_v53 = vadd.f32 %v263_v48, %v825_v26  ;;  %v341_v63 = vmul.f32 %v325_v52, %v213_v55 }
  0xde   :  { %v347_v51 = vpack.c.bf16 %v334_v46, %v333_v44 }
  0xdf   :  { %v651_v24 = vpop.eup %650  ;;  %v232_v45 = vmul.f32 0.044715, %v199_v49  ;;  %v272_v54 = vadd.f32 %v256_v50, %v179_v29  ;;  %v295_v61 = vmul.f32 0.7978846, %v279_v53  ;;  %v216_v16 = vmul.f32 0.5, %v199_v49 }
  0xe0   :  { %439 = vmatmul.bf16.gmra.mxu1 %v347_v51  ;;  %v326_v58 = vadd.f32 1.0, %v651_v24 }
  0xe1   :  { %v288_v59 = vmul.f32 0.7978846, %v272_v54  ;;  %v248_v60 = vmul.f32 %v232_v45, %v199_v49  ;;  %v653_v3 = vpop.eup %652 }
  0xe2   :  { %v342_v0 = vmul.f32 %v326_v58, %v214_v56  ;;  %v319_v47 = vadd.f32 1.0, %v653_v3 }
  0xe3   :  { %654 = vtanh.f32 %v288_v59  ;;  %v264_v23 = vmul.f32 %v248_v60, %v199_v49 }
  0xe4   :  { %v351_v2 = vpack.c.bf16 %v342_v0, %v341_v63  ;;  %656 = vtanh.f32 %v295_v61  ;;  %v335_v9 = vmul.f32 %v319_v47, %v207_v30 }
  0xe5   :  { %v280_v4 = vadd.f32 %v264_v23, %v199_v49 }
  0xe6   :  { %459 = vmatmul.bf16.gmra.mxu3 %v351_v2 }
  0xe7   :  { %v296_v5 = vmul.f32 0.7978846, %v280_v4 }
  0xe9   :  { %v655_v62 = vpop.eup %654  ;;  %658 = vtanh.f32 %v296_v5 }
  0xea   :  { %v320_v6 = vadd.f32 1.0, %v655_v62  ;;  %v657_v8 = vpop.eup %656 }
  0xeb   :  { %v327_v12 = vadd.f32 1.0, %v657_v8 }
  0xec   :  { %v336_v10 = vmul.f32 %v320_v6, %v208_v1 }
  0xed   :  { %v343_v18 = vmul.f32 %v327_v12, %v215_v14 }
  0xee   :  { %v348_v11 = vpack.c.bf16 %v336_v10, %v335_v9 }
  0xef   :  { %v659_v13 = vpop.eup %658 }
  0xf0   :  { %444 = vmatmul.bf16.gmra.mxu1 %v348_v11  ;;  %v328_v17 = vadd.f32 1.0, %v659_v13 }
  0xf2   :  { %v344_v19 = vmul.f32 %v328_v17, %v216_v16 }
  0xf4   :  { %v352_v20 = vpack.c.bf16 %v344_v19, %v343_v18 }
  0xf6   :  { %464 = vmatmul.bf16.gmra.mxu3 %v352_v20 }
 0x13d   :  { %v430_v21 = vpop.f32.mrf.mxu1 }
 0x13e   :  { %v431_v22 = vadd.f32 %v627_v7, %v430_v21 }
 0x140   :  { %470 = vst [vmem:[%s895_s5] sm:$0xff] %v431_v22 }
 0x145   :  { %v432_v25 = vpop.f32.mrf.mxu1 }
 0x146   :  { %v433_v57 = vadd.f32 %v627_v7, %v432_v25 }
 0x148   :  { %471 = vst [vmem:[%s895_s5 + $0x8] sm:$0xff] %v433_v57 }
 0x149   :  { %v450_v26 = vpop.f32.mrf.mxu3 }
 0x14a   :  { %v451_v15 = vadd.f32 %v627_v7, %v450_v26 }
 0x14c   :  { %478 = vst [vmem:[%s895_s5 + $0x40] sm:$0xff] %v451_v15 }
 0x14d   :  { %v435_v27 = vpop.f32.mrf.mxu1 }
 0x14e   :  { %v436_v28 = vadd.f32 %v627_v7, %v435_v27 }
 0x150   :  { %472 = vst [vmem:[%s895_s5 + $0x10] sm:$0xff] %v436_v28 }
 0x151   :  { %v452_v29 = vpop.f32.mrf.mxu3 }
 0x152   :  { %v453_v31 = vadd.f32 %v627_v7, %v452_v29 }
 0x154   :  { %479 = vst [vmem:[%s895_s5 + $0x48] sm:$0xff] %v453_v31 }
 0x155   :  { %v437_v32 = vpop.f32.mrf.mxu1 }
 0x156   :  { %v438_v33 = vadd.f32 %v627_v7, %v437_v32 }
 0x158   :  { %473 = vst [vmem:[%s895_s5 + $0x18] sm:$0xff] %v438_v33 }
 0x159   :  { %v455_v34 = vpop.f32.mrf.mxu3 }
 0x15a   :  { %v456_v35 = vadd.f32 %v627_v7, %v455_v34 }
 0x15c   :  { %480 = vst [vmem:[%s895_s5 + $0x50] sm:$0xff] %v456_v35 }
 0x15d   :  { %v440_v36 = vpop.f32.mrf.mxu1 }
 0x15e   :  { %v441_v37 = vadd.f32 %v627_v7, %v440_v36 }
 0x160   :  { %474 = vst [vmem:[%s895_s5 + $0x20] sm:$0xff] %v441_v37 }
 0x161   :  { %v457_v38 = vpop.f32.mrf.mxu3 }
 0x162   :  { %v458_v39 = vadd.f32 %v627_v7, %v457_v38 }
 0x164   :  { %481 = vst [vmem:[%s895_s5 + $0x58] sm:$0xff] %v458_v39 }
 0x165   :  { %v442_v40 = vpop.f32.mrf.mxu1 }
 0x166   :  { %v443_v41 = vadd.f32 %v627_v7, %v442_v40 }
 0x168   :  { %475 = vst [vmem:[%s895_s5 + $0x28] sm:$0xff] %v443_v41 }
 0x169   :  { %v460_v42 = vpop.f32.mrf.mxu3 }
 0x16a   :  { %v461_v43 = vadd.f32 %v627_v7, %v460_v42 }
 0x16c   :  { %482 = vst [vmem:[%s895_s5 + $0x60] sm:$0xff] %v461_v43 }
 0x16d   :  { %v445_v44 = vpop.f32.mrf.mxu1 }
 0x16e   :  { %v446_v46 = vadd.f32 %v627_v7, %v445_v44 }
 0x170   :  { %476 = vst [vmem:[%s895_s5 + $0x30] sm:$0xff] %v446_v46 }
 0x171   :  { %v462_v48 = vpop.f32.mrf.mxu3 }
 0x172   :  { %v463_v49 = vadd.f32 %v627_v7, %v462_v48 }
 0x174   :  { %483 = vst [vmem:[%s895_s5 + $0x68] sm:$0xff] %v463_v49 }
 0x175   :  { %v447_v50 = vpop.f32.mrf.mxu1 }
 0x176   :  { %v448_v51 = vadd.f32 %v627_v7, %v447_v50 }
 0x178   :  { %477 = vst [vmem:[%s895_s5 + $0x38] sm:$0xff] %v448_v51 }
 0x179   :  { %v465_v52 = vpop.f32.mrf.mxu3 }
 0x17a   :  { %v466_v53 = vadd.f32 %v627_v7, %v465_v52 }
 0x17c   :  { %484 = vst [vmem:[%s895_s5 + $0x70] sm:$0xff] %v466_v53 }
 0x181   :  { %v467_v24 = vpop.f32.mrf.mxu3 }
 0x182   :  { %v468_v45 = vadd.f32 %v627_v7, %v467_v24 }
 0x184   :  { %485 = vst [vmem:[%s895_s5 + $0x78] sm:$0xff] %v468_v45 }

</bundles_post_ra>
